<compile_context>
chip_gen: v6e
topology: v6e:2x2x1
jax: 0.10.0
libtpu: 0.0.40
codegen_flags: <defaults>
</compile_context>

<pallas_src>
import jax
import jax.numpy as jnp
from jax.experimental import pallas as pl
from jax.experimental.pallas import tpu as pltpu


def _pick_tile(dim, target, align=128):
    """Largest multiple of `align` that divides `dim` and is <= `target`;
    falls back to the full dim (always a legal Pallas block extent)."""
    if dim <= target:
        return dim
    t = (target // align) * align
    while t >= align:
        if dim % t == 0:
            return t
        t -= align
    return dim


def _two_tensorcores():
    """Best-effort detection of 2-TensorCore chips (v7x). Never raises."""
    try:
        kind = jax.devices()[0].device_kind.lower()
        return "v7" in kind
    except Exception:
        return False


# -----------------------------------------------------------------------------
# Kernels
# -----------------------------------------------------------------------------
def _pooler_kernel_single_k(x_ref, w_ref, b_ref, o_ref):
    # Whole K in one block: no accumulator scratch, fuse bias + tanh.
    acc = jnp.dot(x_ref[...].astype(w_ref.dtype), w_ref[...],
                  preferred_element_type=jnp.float32)
    o_ref[...] = jnp.tanh(acc + b_ref[...]).astype(o_ref.dtype)


def _pooler_kernel_multi_k(x_ref, w_ref, b_ref, o_ref, acc_ref):
    k = pl.program_id(2)

    @pl.when(k == 0)
    def _():
        # Fold the bias into the accumulator init (saves the zero-fill and the
        # epilogue VPU add).
        acc_ref[...] = jnp.broadcast_to(b_ref[...], acc_ref.shape)

    acc_ref[...] += jnp.dot(x_ref[...].astype(w_ref.dtype), w_ref[...],
                            preferred_element_type=jnp.float32)

    @pl.when(k == pl.num_programs(2) - 1)
    def _():
        o_ref[...] = jnp.tanh(acc_ref[...]).astype(o_ref.dtype)


# -----------------------------------------------------------------------------
# Parameter prep (hoisted out of the hot path)
# -----------------------------------------------------------------------------
def prepare_pooler_params(weight, bias, weight_dtype=jnp.bfloat16):
    """Transpose the PyTorch-style (out, in) weight to (in, out) and cast to
    the MXU compute dtype once at parameter-load time. Bias stays f32."""
    # TODO(synk): optionally quantize the weight (int8 on v5e/v6e, fp8 on v7x)
    # with a per-channel scale in the epilogue to halve HBM weight traffic.
    w_t = jnp.asarray(weight).T.astype(weight_dtype)
    b2d = jnp.asarray(bias).reshape(1, -1).astype(jnp.float32)
    return w_t, b2d


# -----------------------------------------------------------------------------
# Forward wrapper
# -----------------------------------------------------------------------------
def pooler_forward(x, w_t, b2d, *, tile_rows=512, tile_n=2048, tile_k=1024,
                   out_dtype=None):
    """x: (..., hidden_in); w_t: (hidden_in, hidden_out) pre-transposed/cast;
    b2d: (1, hidden_out) f32.  Returns tanh(x @ W^T + b)."""
    in_dim, out_dim = w_t.shape
    assert x.shape[-1] == in_dim
    lead = x.shape[:-1]
    if out_dtype is None:
        out_dtype = x.dtype

    x2d = x.reshape(-1, in_dim)          # pure reshape: no cast, no pad pass
    rows = x2d.shape[0]

    # Row tile: full rows when small (always a legal block extent), otherwise
    # an 8-aligned tile; cdiv grid + dropped OOB stores handle the remainder.
    tm = rows if rows <= tile_rows else tile_rows
    tk = _pick_tile(in_dim, tile_k)
    tn = _pick_tile(out_dim, tile_n)

    # v7x has 2 TensorCores: ensure a "parallel" axis has >= 2 blocks so both
    # cores stream disjoint halves of the HBM-bound weight.
    if _two_tensorcores() and pl.cdiv(rows, tm) * pl.cdiv(out_dim, tn) < 2:
        if out_dim >= 256:
            tn_split = _pick_tile(out_dim, out_dim // 2)
            if tn_split < out_dim:
                tn = tn_split

    k_steps = pl.cdiv(in_dim, tk)

    # VMEM footprint (double-buffered pipeline buffers + f32 accumulator).
    x_item = jnp.dtype(x2d.dtype).itemsize
    w_item = jnp.dtype(w_t.dtype).itemsize
    o_item = jnp.dtype(out_dtype).itemsize
    footprint = (2 * tm * tk * x_item            # x tile
                 + 2 * tk * tn * w_item          # weight tile
                 + 2 * 8 * tn * 4                # bias tile (sublane-padded)
                 + 2 * tm * tn * o_item)         # output tile
    if k_steps > 1:
        footprint += tm * tn * 4                 # f32 accumulator scratch
    if footprint > (40 << 20):
        raise ValueError(
            f"Pooler tile footprint too large for VMEM ({footprint >> 20} MiB);"
            " pad hidden dims to a multiple of 128 at prepare time or lower"
            " the tile_* targets.")
    vmem_bytes = int(min(max(2 * footprint + (4 << 20), 32 << 20), 48 << 20))

    if k_steps == 1:
        grid = (pl.cdiv(rows, tm), pl.cdiv(out_dim, tn))
        grid_spec = pltpu.PrefetchScalarGridSpec(
            num_scalar_prefetch=0,
            grid=grid,
            in_specs=[
                pl.BlockSpec((tm, in_dim), lambda i, j: (i, 0)),
                pl.BlockSpec((in_dim, tn), lambda i, j: (0, j)),
                pl.BlockSpec((1, tn), lambda i, j: (0, j)),
            ],
            out_specs=pl.BlockSpec((tm, tn), lambda i, j: (i, j)),
        )
        kernel = _pooler_kernel_single_k
        dims = ("parallel", "parallel")
    else:
        grid = (pl.cdiv(rows, tm), pl.cdiv(out_dim, tn), k_steps)
        grid_spec = pltpu.PrefetchScalarGridSpec(
            num_scalar_prefetch=0,
            grid=grid,
            in_specs=[
                pl.BlockSpec((tm, tk), lambda i, j, k: (i, k)),
                pl.BlockSpec((tk, tn), lambda i, j, k: (k, j)),
                pl.BlockSpec((1, tn), lambda i, j, k: (0, j)),
            ],
            out_specs=pl.BlockSpec((tm, tn), lambda i, j, k: (i, j)),
            scratch_shapes=[pltpu.VMEM((tm, tn), jnp.float32)],
        )
        kernel = _pooler_kernel_multi_k
        dims = ("parallel", "parallel", "arbitrary")

    out = pl.pallas_call(
        kernel,
        out_shape=jax.ShapeDtypeStruct((rows, out_dim), out_dtype),
        grid_spec=grid_spec,
        compiler_params=pltpu.CompilerParams(
            dimension_semantics=dims,
            vmem_limit_bytes=vmem_bytes,
        ),
    )(x2d, w_t, b2d)

    return out.reshape(lead + (out_dim,))


if __name__ == "__main__":
    # Small shapes consistent with the module's forward: (batch, seq, hidden).
    batch, seq, hidden = 2, 8, 32

    key = jax.random.PRNGKey(0)
    kx, kw, kb = jax.random.split(key, 3)

    x = jax.random.normal(kx, (batch, seq, hidden), dtype=jnp.float32)
    # nn.Linear(hidden, hidden) parameter shapes (PyTorch layout: (out, in)).
    weight = jax.random.normal(kw, (hidden, hidden), dtype=jnp.float32) * 0.02
    bias = jax.random.normal(kb, (hidden,), dtype=jnp.float32) * 0.02

    # One-time parameter prep (transpose + bf16 cast) outside the hot path.
    w_t, b2d = prepare_pooler_params(weight, bias)

    y = pooler_forward(x, w_t, b2d)
    jax.block_until_ready(y)

    # Reference check against plain JAX (same math as nn.Linear + Tanh).
    # Tolerance reflects the deliberate bf16 MXU inputs (f32 accumulation).
    y_ref = jnp.tanh(x @ weight.T + bias)
    assert y.shape == (batch, seq, hidden)
    assert jnp.allclose(y, y_ref, atol=1e-2, rtol=1e-2), \
        float(jnp.max(jnp.abs(y - y_ref)))

    print("KERNEL_OK")
</pallas_src>

<mosaic_0001>
module attributes {stable_mosaic.version = 11 : i64} {
  func.func @_pooler_kernel_single_k(%arg0: i32, %arg1: i32, %arg2: memref<16x32xf32, #tpu.memory_space<vmem>>, %arg3: memref<32x32xbf16, #tpu.memory_space<vmem>>, %arg4: memref<1x32xf32, #tpu.memory_space<vmem>>, %arg5: memref<16x32xf32, #tpu.memory_space<vmem>>) attributes {dimension_semantics = [#tpu.dimension_semantics<parallel>, #tpu.dimension_semantics<parallel>], iteration_bounds = array<i64: 1, 1>, scalar_prefetch = 0 : i64, scratch_operands = 0 : i64, tpu.core_type = #tpu.core_type<tc>, window_params = [{transform_indices = @transform_0, window_bounds = array<i64: 16, 32>}, {transform_indices = @transform_1, window_bounds = array<i64: 32, 32>}, {transform_indices = @transform_2, window_bounds = array<i64: 1, 32>}, {transform_indices = @transform_3, window_bounds = array<i64: 16, 32>}]} {
    %c0 = arith.constant 0 : index
    %c0_0 = arith.constant 0 : index
    %0 = vector.load %arg2[%c0, %c0_0] : memref<16x32xf32, #tpu.memory_space<vmem>>, vector<16x32xf32>
    %1 = arith.truncf %0 : vector<16x32xf32> to vector<16x32xbf16>
    %c0_1 = arith.constant 0 : index
    %c0_2 = arith.constant 0 : index
    %2 = vector.load %arg3[%c0_1, %c0_2] : memref<32x32xbf16, #tpu.memory_space<vmem>>, vector<32x32xbf16>
    %cst = arith.constant dense<0.000000e+00> : vector<16x32xf32>
    %3 = tpu.matmul %1, %2, %cst {dimension_numbers = #tpu.dot_dimension_numbers<[1], [0], [0], [1], [0, 0, 1, 1], [], []>} : vector<16x32xbf16>, vector<32x32xbf16>, vector<16x32xf32> -> vector<16x32xf32>
    %c0_3 = arith.constant 0 : index
    %c0_4 = arith.constant 0 : index
    %4 = vector.load %arg4[%c0_3, %c0_4] : memref<1x32xf32, #tpu.memory_space<vmem>>, vector<1x32xf32>
    %5 = vector.broadcast %4 : vector<1x32xf32> to vector<16x32xf32>
    %6 = arith.addf %3, %5 : vector<16x32xf32>
    %7 = math.tanh %6 : vector<16x32xf32>
    %c0_5 = arith.constant 0 : index
    %c0_6 = arith.constant 0 : index
    %8 = vector.load %arg5[%c0_5, %c0_6] : memref<16x32xf32, #tpu.memory_space<vmem>>, vector<16x32xf32>
    tpu.vector_store %arg5[%c0_5, %c0_6], %7 {strides = array<i32>} : memref<16x32xf32, #tpu.memory_space<vmem>>, vector<16x32xf32>,
    return
  }
  func.func @transform_0(%arg0: i32, %arg1: i32) -> (i32, i32) {
    %c0_i32 = arith.constant 0 : i32
    %c0_i32_0 = arith.constant 0 : i32
    return %arg0, %c0_i32 : i32, i32
  }
  func.func @transform_1(%arg0: i32, %arg1: i32) -> (i32, i32) {
    %c0_i32 = arith.constant 0 : i32
    %c0_i32_0 = arith.constant 0 : i32
    return %c0_i32, %arg1 : i32, i32
  }
  func.func @transform_2(%arg0: i32, %arg1: i32) -> (i32, i32) {
    %c0_i32 = arith.constant 0 : i32
    %c0_i32_0 = arith.constant 0 : i32
    return %c0_i32, %arg1 : i32, i32
  }
  func.func @transform_3(%arg0: i32, %arg1: i32) -> (i32, i32) {
    %c0_i32 = arith.constant 0 : i32
    return %arg0, %arg1 : i32, i32
  }
}

</mosaic_0001>

<bundles_post_ra>
// kernel: tpu_custom_call.1
= control target key start
LH: loop header
LB: loop body
LE: loop exit
PB: predicated region body
PF: predicated region fallthrough
CT: control target
= control target key end

     0   :  { %8 = vsyncpa [#allocation3], 0  ;;  %s283_s0 = inlined_call_operand.hbm [shape: f32[16,32], index: 0, kind: input, shape index: {}]   ;;  %s284_s1 = inlined_call_operand.hbm [shape: bf16[32,32], index: 1, kind: input, shape index: {}]   ;;  %s285_s2 = inlined_call_operand.vmem [shape: f32[1,32], index: 2, kind: input, shape index: {}]   ;;  %s286_s3 = inlined_call_operand.hbm [shape: f32[16,32], index: 3, kind: output, shape index: {}]  }
   0x1   :  { %9 = vsyncpa [#allocation6], 0 }
   0x2   :  { %10 = vsyncpa [#allocation4], 0  ;;  %s233_s12 = smov [#allocation2]  }
   0x3   :  { %s16_s13 = sshll.u32 %s233_s12, 4  ;;  %s17_s13 = int_to_ptr.vmem [resolvable:$true] %s16_s13 }
   0x4   :  { %s175_s14 = scalar_lea.vmem %s17_s13, 256  ;;  %p180_p1 = scmp.lt.s32.totalorder %s17_s13, %s17_s13 }
   0x5   :  { %p176_p0 = scmp.ne.s32.totalorder %s17_s13, %s175_s14  ;;  %p181_p2 = scmp.lt.s32.totalorder %s175_s14, %s175_s14 }
   0x7   :  { %p182_p3 = por %p181_p2, %p180_p1 }
   0x9   :  { %p183_p4 = pnand %p182_p3, %p176_p0 }
   0xb   :  { %186 = shalt.err (!%p183_p4)
}
   0xc   :  { %s234_s15 = smov 128   ;;  %s235_s16 = smov 8  }
   0xd   :  { %22 = dma.hbm_to_vmem [thread:$0]  %s283_s0, 256, %s17_s13, [#allocation3], %s234_s15, %s234_s15, %s235_s16  }
   0xe   :  { %s236_s19 = smov [#allocation5]  }
   0xf   :  { %s28_s20 = sshll.u32 %s236_s19, 4  ;;  %s29_s20 = int_to_ptr.vmem [resolvable:$true] %s28_s20 }
  0x10   :  { %s195_s21 = scalar_lea.vmem %s29_s20, 256  ;;  %p200_p6 = scmp.lt.s32.totalorder %s29_s20, %s29_s20 }
  0x11   :  { %p196_p5 = scmp.ne.s32.totalorder %s29_s20, %s195_s21  ;;  %p201_p7 = scmp.lt.s32.totalorder %s195_s21, %s195_s21 }
  0x13   :  { %p202_p8 = por %p201_p7, %p200_p6 }
  0x15   :  { %p203_p9 = pnand %p202_p8, %p196_p5 }
  0x17   :  { %206 = shalt.err (!%p203_p9)
}
  0x18   :  { %s237_s22 = smov 64   ;;  %s238_s23 = smov 4  }
  0x19   :  { %34 = dma.hbm_to_vmem [thread:$0]  %s284_s1, 256, %s29_s20, [#allocation6], %s237_s22, %s237_s22, %s238_s23  }
  0x1a   :  { %227 = dma.done.wait [#allocation3], 256  }
  0x1b   :  { %228 = vsyncadd [#allocation3], 4294967040 }
  0x1c   :  { %229 = dma.done.wait [#allocation6], 256  }
  0x1d   :  { %230 = vsyncadd [#allocation6], 4294967040  ;;  %v239_v0 = vmov 0.0   ;;  %vm240_vm0 = vmmov 0   ;;  %v161_v1 = vld [vmem:[#allocation5 + $0x8] sm:$0xff]   ;;  %v162_v2 = vld [vmem:[#allocation5] sm:$0xff]  }
  0x1e   :  { %144 = vmatprep.subr.bf16.mxu0 %v239_v0  ;;  %148 = vmatprep.mubr.msk.bf16.mxu0 %vm240_vm0, %v239_v0  ;;  %v44_v3 = vld [vmem:[#allocation2] sm:$0xff]  ;;  %v45_v4 = vld [vmem:[#allocation2 + $0x8] sm:$0xff]  ;;  %vm70_vm1 = vcmask 261120   ;;  %s241_s26 = smov [#allocation7]  }
  0x1f   :  { %145 = vmatpush3.bf16.msra.mxu0 %v161_v1  ;;  %v46_v5 = vpack.c.bf16 %v45_v4, %v44_v3  ;;  %v137_v6 = vld [vmem:[%s285_s2] ss:$0 sm:$0xff]  ;;  %s124_s27 = sshll.u32 %s241_s26, 4  ;;  %s125_s27 = int_to_ptr.vmem [resolvable:$true] %s124_s27 }
  0x20   :  { %146 = vmatprep.subr.bf16.mxu0 %v239_v0  ;;  %s207_s28 = scalar_lea.vmem %s125_s27, 256  ;;  %p212_p11 = scmp.lt.s32.totalorder %s125_s27, %s125_s27 }
  0x21   :  { %p208_p10 = scmp.ne.s32.totalorder %s125_s27, %s207_s28  ;;  %p213_p12 = scmp.lt.s32.totalorder %s207_s28, %s207_s28 }
  0x23   :  { %147 = vmatpush3.bf16.msra.mxu0 %v162_v2  ;;  %p214_p13 = por %p213_p12, %p212_p11 }
  0x25   :  { %p215_p0 = pnand %p214_p13, %p208_p10 }
  0x26   :  { %149 = vmatmul.mubr.msk.bf16.vlgmr.msra.gmra.mxu0 %vm70_vm1, %v46_v5 }
  0xe6   :  { %v108_v7 = vpop.f32.mrf.mxu0 }
  0xe7   :  { %v109_v8 = vadd.f32 %v137_v6, %v108_v7 }
  0xe8   :  { %v150_v9 = vpop.f32.mrf.mxu0 }
  0xe9   :  { %163 = vtanh.f32 %v109_v8 }
  0xea   :  { %v111_v10 = vpop.f32.mrf.mxu0 }
  0xeb   :  { %v112_v11 = vadd.f32 %v137_v6, %v111_v10 }
  0xec   :  { %v151_v12 = vpop.f32.mrf.mxu0 }
  0xed   :  { %165 = vtanh.f32 %v112_v11 }
  0xf6   :  { %v164_v13 = vpop.eup %163 }
  0xf7   :  { %117 = vst.msk [vmem:[#allocation7] sm:$0xff] %vm70_vm1, %v164_v13 }
  0xfa   :  { %v166_v14 = vpop.eup %165 }
  0xfb   :  { %118 = vst.msk [vmem:[#allocation7 + $0x8] sm:$0xff] %vm70_vm1, %v166_v14 }
  0xfc   :  { %218 = shalt.err (!%p215_p0)
}
  0xfd   :  { %130 = dma.vmem_to_hbm [thread:$0]  %s125_s27, 256, %s286_s3, [#allocation4], %s234_s15, %s234_s15, %s235_s16  }
  0xfe   :  { %231 = dma.done.wait [#allocation4], 256  }
  0xff   :  { %232 = vsyncadd [#allocation4], 4294967040 }
 0x100   :  { %134 = vsyncpa [#allocation3], 1 }
 0x101   :  { %135 = vsyncpa [#allocation6], 1 }
 0x102   :  { %136 = vsyncpa [#allocation4], 1 }

</bundles_post_ra>
